<compile_context>
chip_gen: v7x
topology: tpu7x:2x2x1
jax: 0.10.0
libtpu: 0.0.40
codegen_flags: <defaults>
</compile_context>

<pallas_src>
import jax
import jax.numpy as jnp
from jax.experimental import pallas as pl
from jax.experimental.pallas import tpu as pltpu

N_IN = 4      # input features  (Linear(4, 3))
N_HID = 3     # hidden units    (Linear(3, 1))
_SUB = 16     # sublanes per batch block (bf16 native packing, 2 f32 vregs)
_GRAIN = _SUB * 128   # minimal batch granule: 16 sublanes x 128 lanes


def _discriminator_kernel(x_ref, p_ref, out_ref):
    # x_ref:   (4, 16, TBL) VMEM — feature k is x_ref[k], a dense (16, TBL) block.
    # p_ref:   (19,) SMEM f32 = [w1 row-major (in,hid):12 | b1:3 | w2:3 | b2:1]
    # out_ref: (16, TBL) VMEM — dense, lane-aligned output block.
    xs = [x_ref[k].astype(jnp.float32) for k in range(N_IN)]   # 4 hoisted vlds

    y = None
    for j in range(N_HID):
        # Hidden pre-activation: unrolled VPU broadcast-MACs over 4 features.
        h = xs[0] * p_ref[j]                              # w1[0, j]
        for k in range(1, N_IN):
            h = h + xs[k] * p_ref[k * N_HID + j]          # w1[k, j]
        h = h + p_ref[12 + j]                             # b1[j]
        h = 0.5 * jnp.tanh(0.5 * h) + 0.5                 # sigmoid: 1 EUP push
        t = h * p_ref[15 + j]                             # w2[j, 0]
        y = t if y is None else y + t

    y = y + p_ref[18]                                     # b2[0]
    y = 0.5 * jnp.tanh(0.5 * y) + 0.5                     # sigmoid: 1 EUP push
    out_ref[...] = y.astype(out_ref.dtype)


def _choose_tile(batch, block_b):
    """Pick (tile, padded_batch), both multiples of _GRAIN, with
    padded_batch = n_steps * tile and n_steps >= 2 whenever the batch spans
    more than one granule (so v7x shards the 'parallel' axis over both TCs)."""
    bp_min = pl.cdiv(batch, _GRAIN) * _GRAIN
    block_b = max(_GRAIN, (block_b // _GRAIN) * _GRAIN)
    n = pl.cdiv(bp_min, block_b)
    if bp_min >= 2 * _GRAIN:
        n = max(n, 2)
    tile = pl.cdiv(bp_min, n * _GRAIN) * _GRAIN
    return tile, n * tile


def discriminator_forward_fm(x_fm, w1, b1, w2, b2, *, block_b=131072):
    """Fast path: feature-major input (no transpose HBM pass).

    x_fm: (4, B) float32 or bfloat16 (bf16 ~halves HBM traffic; compute is f32)
    w1: (4, 3), b1: (3,), w2: (3, 1), b2: (1,)  — weights stored as (in, out)
    Returns (B, 1) float32.
    """
    n_in, B = x_fm.shape
    assert n_in == N_IN

    tb, bp = _choose_tile(B, block_b)
    if bp != B:
        # Only hit when B is not already a multiple of 2048; producers that
        # pad upstream skip this extra HBM pass entirely.
        x_fm = jnp.pad(x_fm, ((0, 0), (0, bp - B)))

    tbl = tb // _SUB                 # lanes per grid step (multiple of 128)
    cols = bp // _SUB
    x3 = x_fm.reshape(N_IN, _SUB, cols)   # zero-copy row-major reshape

    # All 19 parameters packed into one flat SMEM scalar array.
    params = jnp.concatenate([
        w1.astype(jnp.float32).reshape(-1),    # (12,) row-major (in, hid)
        b1.astype(jnp.float32).reshape(-1),    # (3,)
        w2.astype(jnp.float32).reshape(-1),    # (3,)
        b2.astype(jnp.float32).reshape(-1),    # (1,)
    ])                                          # (19,)

    out2 = pl.pallas_call(
        _discriminator_kernel,
        out_shape=jax.ShapeDtypeStruct((_SUB, cols), jnp.float32),
        grid=(bp // tb,),
        in_specs=[
            pl.BlockSpec((N_IN, _SUB, tbl), lambda i: (0, 0, i)),   # x tile
            pl.BlockSpec(memory_space=pltpu.MemorySpace.SMEM),      # params
        ],
        out_specs=pl.BlockSpec((_SUB, tbl), lambda i: (0, i)),
        compiler_params=pltpu.CompilerParams(
            dimension_semantics=("parallel",)),   # shard batch across v7x TCs
    )(x3, params)

    # Row-major flatten of (16, cols) puts element (s, l) at batch index
    # s*cols + l — exactly how the reshape above distributed the batch.
    return out2.reshape(bp)[:B].reshape(B, 1)


def discriminator_forward(x, w1, b1, w2, b2, *, block_b=131072):
    """PyTorch-layout entry point: x is batch-major (B, 4).

    The transpose to feature-major costs one extra HBM pass; producers that
    can emit (4, B) (or bf16) directly should call discriminator_forward_fm.
    """
    return discriminator_forward_fm(jnp.transpose(x), w1, b1, w2, b2,
                                    block_b=block_b)


def init_params(key):
    """nn.Linear-style init; weights kept transposed as (in, out)."""
    k1, k2, k3, k4 = jax.random.split(key, 4)
    bound1 = 1.0 / jnp.sqrt(4.0)
    bound2 = 1.0 / jnp.sqrt(3.0)
    w1 = jax.random.uniform(k1, (N_IN, N_HID), jnp.float32, -bound1, bound1)
    b1 = jax.random.uniform(k2, (N_HID,), jnp.float32, -bound1, bound1)
    w2 = jax.random.uniform(k3, (N_HID, 1), jnp.float32, -bound2, bound2)
    b2 = jax.random.uniform(k4, (1,), jnp.float32, -bound2, bound2)
    return w1, b1, w2, b2


def reference_forward(x, w1, b1, w2, b2):
    h = jax.nn.sigmoid(x @ w1 + b1)
    return jax.nn.sigmoid(h @ w2 + b2)


if __name__ == "__main__":
    key = jax.random.PRNGKey(0)
    kx, kx2, kp = jax.random.split(key, 3)
    w1, b1, w2, b2 = init_params(kp)

    # Small batch (single padded 2048-element block).
    B = 8
    x = jax.random.uniform(kx, (B, N_IN), jnp.float32)
    out = jax.block_until_ready(discriminator_forward(x, w1, b1, w2, b2))
    ref = reference_forward(x, w1, b1, w2, b2)
    assert out.shape == (B, 1)
    assert jnp.allclose(out, ref, atol=1e-4), float(jnp.max(jnp.abs(out - ref)))

    # Batch exercising padding + a multi-step grid (2 steps, v7x-shardable).
    B2 = 3000
    x2 = jax.random.uniform(kx2, (B2, N_IN), jnp.float32)
    out2 = jax.block_until_ready(discriminator_forward(x2, w1, b1, w2, b2))
    ref2 = reference_forward(x2, w1, b1, w2, b2)
    assert out2.shape == (B2, 1)
    assert jnp.allclose(out2, ref2, atol=1e-4), float(jnp.max(jnp.abs(out2 - ref2)))

    # TODO(synk): train() (MSELoss + SGD step) and plot_progress() are
    # host-side training/plotting logic, not part of the forward kernel.
    print("KERNEL_OK")
</pallas_src>

<mosaic_0001>
module attributes {stable_mosaic.version = 11 : i64} {
  func.func @_discriminator_kernel(%arg0: i32, %arg1: memref<4x16x128xf32, #tpu.memory_space<vmem>>, %arg2: memref<19xf32, #tpu.memory_space<smem>>, %arg3: memref<16x128xf32, #tpu.memory_space<vmem>>) attributes {dimension_semantics = [#tpu.dimension_semantics<parallel>], iteration_bounds = array<i64: 1>, scalar_prefetch = 0 : i64, scratch_operands = 0 : i64, tpu.core_type = #tpu.core_type<tc>, window_params = [{transform_indices = @transform_0, window_bounds = array<i64: 4, 16, 128>}, {transform_indices = @transform_1, window_bounds = array<i64: 19>}, {transform_indices = @transform_2, window_bounds = array<i64: 16, 128>}]} {
    %c0 = arith.constant 0 : index
    %c0_0 = arith.constant 0 : index
    %c0_1 = arith.constant 0 : index
    %0 = vector.load %arg1[%c0, %c0_0, %c0_1] : memref<4x16x128xf32, #tpu.memory_space<vmem>>, vector<1x16x128xf32>
    %1 = vector.shape_cast %0 : vector<1x16x128xf32> to vector<16x128xf32>
    %c1 = arith.constant 1 : index
    %c0_2 = arith.constant 0 : index
    %c0_3 = arith.constant 0 : index
    %2 = vector.load %arg1[%c1, %c0_2, %c0_3] : memref<4x16x128xf32, #tpu.memory_space<vmem>>, vector<1x16x128xf32>
    %3 = vector.shape_cast %2 : vector<1x16x128xf32> to vector<16x128xf32>
    %c2 = arith.constant 2 : index
    %c0_4 = arith.constant 0 : index
    %c0_5 = arith.constant 0 : index
    %4 = vector.load %arg1[%c2, %c0_4, %c0_5] : memref<4x16x128xf32, #tpu.memory_space<vmem>>, vector<1x16x128xf32>
    %5 = vector.shape_cast %4 : vector<1x16x128xf32> to vector<16x128xf32>
    %c3 = arith.constant 3 : index
    %c0_6 = arith.constant 0 : index
    %c0_7 = arith.constant 0 : index
    %6 = vector.load %arg1[%c3, %c0_6, %c0_7] : memref<4x16x128xf32, #tpu.memory_space<vmem>>, vector<1x16x128xf32>
    %7 = vector.shape_cast %6 : vector<1x16x128xf32> to vector<16x128xf32>
    %c0_8 = arith.constant 0 : index
    %8 = memref.load %arg2[%c0_8] : memref<19xf32, #tpu.memory_space<smem>>
    %9 = vector.broadcast %8 : f32 to vector<16x128xf32>
    %10 = arith.mulf %1, %9 : vector<16x128xf32>
    %c3_9 = arith.constant 3 : index
    %11 = memref.load %arg2[%c3_9] : memref<19xf32, #tpu.memory_space<smem>>
    %12 = vector.broadcast %11 : f32 to vector<16x128xf32>
    %13 = arith.mulf %3, %12 : vector<16x128xf32>
    %14 = arith.addf %10, %13 : vector<16x128xf32>
    %c6 = arith.constant 6 : index
    %15 = memref.load %arg2[%c6] : memref<19xf32, #tpu.memory_space<smem>>
    %16 = vector.broadcast %15 : f32 to vector<16x128xf32>
    %17 = arith.mulf %5, %16 : vector<16x128xf32>
    %18 = arith.addf %14, %17 : vector<16x128xf32>
    %c9 = arith.constant 9 : index
    %19 = memref.load %arg2[%c9] : memref<19xf32, #tpu.memory_space<smem>>
    %20 = vector.broadcast %19 : f32 to vector<16x128xf32>
    %21 = arith.mulf %7, %20 : vector<16x128xf32>
    %22 = arith.addf %18, %21 : vector<16x128xf32>
    %c12 = arith.constant 12 : index
    %23 = memref.load %arg2[%c12] : memref<19xf32, #tpu.memory_space<smem>>
    %24 = vector.broadcast %23 : f32 to vector<16x128xf32>
    %25 = arith.addf %22, %24 : vector<16x128xf32>
    %cst = arith.constant 5.000000e-01 : f32
    %26 = vector.broadcast %cst : f32 to vector<16x128xf32>
    %27 = arith.mulf %26, %25 : vector<16x128xf32>
    %28 = math.tanh %27 : vector<16x128xf32>
    %cst_10 = arith.constant 5.000000e-01 : f32
    %29 = vector.broadcast %cst_10 : f32 to vector<16x128xf32>
    %30 = arith.mulf %29, %28 : vector<16x128xf32>
    %cst_11 = arith.constant 5.000000e-01 : f32
    %31 = vector.broadcast %cst_11 : f32 to vector<16x128xf32>
    %32 = arith.addf %30, %31 : vector<16x128xf32>
    %c15 = arith.constant 15 : index
    %33 = memref.load %arg2[%c15] : memref<19xf32, #tpu.memory_space<smem>>
    %34 = vector.broadcast %33 : f32 to vector<16x128xf32>
    %35 = arith.mulf %32, %34 : vector<16x128xf32>
    %c1_12 = arith.constant 1 : index
    %36 = memref.load %arg2[%c1_12] : memref<19xf32, #tpu.memory_space<smem>>
    %37 = vector.broadcast %36 : f32 to vector<16x128xf32>
    %38 = arith.mulf %1, %37 : vector<16x128xf32>
    %c4 = arith.constant 4 : index
    %39 = memref.load %arg2[%c4] : memref<19xf32, #tpu.memory_space<smem>>
    %40 = vector.broadcast %39 : f32 to vector<16x128xf32>
    %41 = arith.mulf %3, %40 : vector<16x128xf32>
    %42 = arith.addf %38, %41 : vector<16x128xf32>
    %c7 = arith.constant 7 : index
    %43 = memref.load %arg2[%c7] : memref<19xf32, #tpu.memory_space<smem>>
    %44 = vector.broadcast %43 : f32 to vector<16x128xf32>
    %45 = arith.mulf %5, %44 : vector<16x128xf32>
    %46 = arith.addf %42, %45 : vector<16x128xf32>
    %c10 = arith.constant 10 : index
    %47 = memref.load %arg2[%c10] : memref<19xf32, #tpu.memory_space<smem>>
    %48 = vector.broadcast %47 : f32 to vector<16x128xf32>
    %49 = arith.mulf %7, %48 : vector<16x128xf32>
    %50 = arith.addf %46, %49 : vector<16x128xf32>
    %c13 = arith.constant 13 : index
    %51 = memref.load %arg2[%c13] : memref<19xf32, #tpu.memory_space<smem>>
    %52 = vector.broadcast %51 : f32 to vector<16x128xf32>
    %53 = arith.addf %50, %52 : vector<16x128xf32>
    %cst_13 = arith.constant 5.000000e-01 : f32
    %54 = vector.broadcast %cst_13 : f32 to vector<16x128xf32>
    %55 = arith.mulf %54, %53 : vector<16x128xf32>
    %56 = math.tanh %55 : vector<16x128xf32>
    %cst_14 = arith.constant 5.000000e-01 : f32
    %57 = vector.broadcast %cst_14 : f32 to vector<16x128xf32>
    %58 = arith.mulf %57, %56 : vector<16x128xf32>
    %cst_15 = arith.constant 5.000000e-01 : f32
    %59 = vector.broadcast %cst_15 : f32 to vector<16x128xf32>
    %60 = arith.addf %58, %59 : vector<16x128xf32>
    %c16 = arith.constant 16 : index
    %61 = memref.load %arg2[%c16] : memref<19xf32, #tpu.memory_space<smem>>
    %62 = vector.broadcast %61 : f32 to vector<16x128xf32>
    %63 = arith.mulf %60, %62 : vector<16x128xf32>
    %64 = arith.addf %35, %63 : vector<16x128xf32>
    %c2_16 = arith.constant 2 : index
    %65 = memref.load %arg2[%c2_16] : memref<19xf32, #tpu.memory_space<smem>>
    %66 = vector.broadcast %65 : f32 to vector<16x128xf32>
    %67 = arith.mulf %1, %66 : vector<16x128xf32>
    %c5 = arith.constant 5 : index
    %68 = memref.load %arg2[%c5] : memref<19xf32, #tpu.memory_space<smem>>
    %69 = vector.broadcast %68 : f32 to vector<16x128xf32>
    %70 = arith.mulf %3, %69 : vector<16x128xf32>
    %71 = arith.addf %67, %70 : vector<16x128xf32>
    %c8 = arith.constant 8 : index
    %72 = memref.load %arg2[%c8] : memref<19xf32, #tpu.memory_space<smem>>
    %73 = vector.broadcast %72 : f32 to vector<16x128xf32>
    %74 = arith.mulf %5, %73 : vector<16x128xf32>
    %75 = arith.addf %71, %74 : vector<16x128xf32>
    %c11 = arith.constant 11 : index
    %76 = memref.load %arg2[%c11] : memref<19xf32, #tpu.memory_space<smem>>
    %77 = vector.broadcast %76 : f32 to vector<16x128xf32>
    %78 = arith.mulf %7, %77 : vector<16x128xf32>
    %79 = arith.addf %75, %78 : vector<16x128xf32>
    %c14 = arith.constant 14 : index
    %80 = memref.load %arg2[%c14] : memref<19xf32, #tpu.memory_space<smem>>
    %81 = vector.broadcast %80 : f32 to vector<16x128xf32>
    %82 = arith.addf %79, %81 : vector<16x128xf32>
    %cst_17 = arith.constant 5.000000e-01 : f32
    %83 = vector.broadcast %cst_17 : f32 to vector<16x128xf32>
    %84 = arith.mulf %83, %82 : vector<16x128xf32>
    %85 = math.tanh %84 : vector<16x128xf32>
    %cst_18 = arith.constant 5.000000e-01 : f32
    %86 = vector.broadcast %cst_18 : f32 to vector<16x128xf32>
    %87 = arith.mulf %86, %85 : vector<16x128xf32>
    %cst_19 = arith.constant 5.000000e-01 : f32
    %88 = vector.broadcast %cst_19 : f32 to vector<16x128xf32>
    %89 = arith.addf %87, %88 : vector<16x128xf32>
    %c17 = arith.constant 17 : index
    %90 = memref.load %arg2[%c17] : memref<19xf32, #tpu.memory_space<smem>>
    %91 = vector.broadcast %90 : f32 to vector<16x128xf32>
    %92 = arith.mulf %89, %91 : vector<16x128xf32>
    %93 = arith.addf %64, %92 : vector<16x128xf32>
    %c18 = arith.constant 18 : index
    %94 = memref.load %arg2[%c18] : memref<19xf32, #tpu.memory_space<smem>>
    %95 = vector.broadcast %94 : f32 to vector<16x128xf32>
    %96 = arith.addf %93, %95 : vector<16x128xf32>
    %cst_20 = arith.constant 5.000000e-01 : f32
    %97 = vector.broadcast %cst_20 : f32 to vector<16x128xf32>
    %98 = arith.mulf %97, %96 : vector<16x128xf32>
    %99 = math.tanh %98 : vector<16x128xf32>
    %cst_21 = arith.constant 5.000000e-01 : f32
    %100 = vector.broadcast %cst_21 : f32 to vector<16x128xf32>
    %101 = arith.mulf %100, %99 : vector<16x128xf32>
    %cst_22 = arith.constant 5.000000e-01 : f32
    %102 = vector.broadcast %cst_22 : f32 to vector<16x128xf32>
    %103 = arith.addf %101, %102 : vector<16x128xf32>
    %c0_23 = arith.constant 0 : index
    %c0_24 = arith.constant 0 : index
    %104 = vector.load %arg3[%c0_23, %c0_24] : memref<16x128xf32, #tpu.memory_space<vmem>>, vector<16x128xf32>
    tpu.vector_store %arg3[%c0_23, %c0_24], %103 {strides = array<i32>} : memref<16x128xf32, #tpu.memory_space<vmem>>, vector<16x128xf32>,
    return
  }
  func.func @transform_0(%arg0: i32) -> (i32, i32, i32) {
    %c0_i32 = arith.constant 0 : i32
    %c0_i32_0 = arith.constant 0 : i32
    %c0_i32_1 = arith.constant 0 : i32
    return %c0_i32, %c0_i32_0, %arg0 : i32, i32, i32
  }
  func.func @transform_1(%arg0: i32) -> i32 {
    %c0_i32 = arith.constant 0 : i32
    %c0_i32_0 = arith.constant 0 : i32
    return %c0_i32 : i32
  }
  func.func @transform_2(%arg0: i32) -> (i32, i32) {
    %c0_i32 = arith.constant 0 : i32
    %c0_i32_0 = arith.constant 0 : i32
    return %c0_i32, %arg0 : i32, i32
  }
}

</mosaic_0001>

<bundles_post_ra>
// kernel: tpu_custom_call.1
= control target key start
LH: loop header
LB: loop body
LE: loop exit
PB: predicated region body
PF: predicated region fallthrough
CT: control target
= control target key end

     0   :  { %7 = vsyncpa [#allocation3], 0  ;;  %s405_s0 = inlined_call_operand.hbm [shape: f32[4,16,128], index: 0, kind: input, shape index: {}]   ;;  %s406_s1 = inlined_call_operand.vmem [shape: f32[19], index: 1, kind: input, shape index: {}]   ;;  %s407_s2 = inlined_call_operand.hbm [shape: f32[16,128], index: 2, kind: output, shape index: {}]  }
   0x1   :  { %8 = vsyncpa [#allocation5], 0 }
   0x2   :  { %9 = vsyncpa [#allocation4], 0  ;;  %s301_s9 = smov [#allocation2]   ;;  %s28_s13 = sshll.u32 %s406_s1, 4  ;;  %s29_s13 = int_to_ptr.vmem [resolvable:$true] %s28_s13 }
   0x3   :  { %s15_s10 = sshll.u32 %s301_s9, 4  ;;  %s239_s16 = scalar_lea.hbm %s405_s0, 1024  ;;  %s16_s10 = int_to_ptr.vmem [resolvable:$true] %s15_s10 }
   0x4   :  { %p240_p0 = scmp.ne.s32.totalorder %s405_s0, %s239_s16  ;;  %p243_p1 = scmp.lt.u32.totalorder %s239_s16, %s405_s0 }
   0x6   :  { %p245_p2 = pnand %p243_p1, %p240_p0 }
   0x8   :  { %248 = shalt.err (!%p245_p2)
}
   0x9   :  { %s249_s21 = scalar_lea.vmem %s16_s10, 1024  ;;  %p254_p4 = scmp.lt.s32.totalorder %s16_s10, %s16_s10 }
   0xa   :  { %p250_p3 = scmp.ne.s32.totalorder %s16_s10, %s249_s21  ;;  %p255_p5 = scmp.lt.s32.totalorder %s249_s21, %s249_s21 }
   0xc   :  { %p256_p6 = por %p255_p5, %p254_p4 }
   0xe   :  { %p257_p7 = pnand %p256_p6, %p250_p3 }
  0x10   :  { %260 = shalt.err (!%p257_p7)
}
  0x11   :  { %s302_s1 = smov 128   ;;  %s303_s22 = smov 8  }
  0x12   :  { %21 = dma.hbm_to_vmem [thread:$0]  %s405_s0, 1024, %s16_s10, [#allocation3], %s302_s1, %s302_s1, %s303_s22  }
  0x13   :  { %s261_s25 = scalar_lea.vmem %s29_s13, 16  ;;  %p266_p9 = scmp.lt.s32.totalorder %s29_s13, %s29_s13 }
  0x14   :  { %p262_p8 = scmp.ne.s32.totalorder %s29_s13, %s261_s25  ;;  %p267_p10 = scmp.lt.s32.totalorder %s261_s25, %s261_s25 }
  0x16   :  { %p268_p11 = por %p267_p10, %p266_p9 }
  0x18   :  { %p269_p12 = pnand %p268_p11, %p262_p8 }
  0x1a   :  { %272 = shalt.err (!%p269_p12)
}
  0x1b   :  { %s304_s26 = smov [#allocation6]  }
  0x1c   :  { %31 = dma.vmem_to_smem %s29_s13, 16, %s304_s26, [#allocation5]  }
  0x1d   :  { %295 = dma.done.wait [#allocation3], 1024  }
  0x1e   :  { %296 = vsyncadd [#allocation3], 4294966272 }
  0x1f   :  { %297 = dma.done.wait [#allocation5], 16  }
  0x20   :  { %298 = vsyncadd [#allocation5], 4294967280 }
  0x21   :  { %38 = sfence }
  0x22   :  { %s50_s27 = sld [smem:[#allocation6]]  ;;  %s339_s28 = sld [smem:[#allocation6 + $0x3]]  ;;  %v39_v0 = vld [vmem:[#allocation2] sm:$0xff]  ;;  %v42_v1 = vld [vmem:[#allocation2 + $0x10] sm:$0xff]  ;;  %v40_v5 = vld [vmem:[#allocation2 + $0x8] sm:$0xff] }
  0x23   :  { %s341_s29 = sld [smem:[#allocation6 + $0x6]]  ;;  %s343_s0 = sld [smem:[#allocation6 + $0x9]]  ;;  %v45_v2 = vld [vmem:[#allocation2 + $0x20] sm:$0xff]  ;;  %v48_v3 = vld [vmem:[#allocation2 + $0x30] sm:$0xff]  ;;  %v43_v14 = vld [vmem:[#allocation2 + $0x18] sm:$0xff] }
  0x24   :  { %s345_s30 = sld [smem:[#allocation6 + $0xc]]  ;;  %s347_s3 = sld [smem:[#allocation6 + $0x1]]  ;;  %v46_v36 = vld [vmem:[#allocation2 + $0x28] sm:$0xff]  ;;  %v49_v37 = vld [vmem:[#allocation2 + $0x38] sm:$0xff] }
  0x25   :  { %s349_s4 = sld [smem:[#allocation6 + $0x4]]  ;;  %s351_s5 = sld [smem:[#allocation6 + $0x7]] }
  0x26   :  { %s353_s6 = sld [smem:[#allocation6 + $0xa]]  ;;  %s355_s7 = sld [smem:[#allocation6 + $0xd]] }
  0x27   :  { %s357_s8 = sld [smem:[#allocation6 + $0x2]]  ;;  %s361_s9 = sld [smem:[#allocation6 + $0x5]] }
  0x28   :  { %v51_v4 = vstv %s50_s27  ;;  %v55_v7 = vstv %s339_s28  ;;  %s363_s10 = sld [smem:[#allocation6 + $0x8]]  ;;  %s366_s11 = sld [smem:[#allocation6 + $0xb]] }
  0x29   :  { %v52_v6 = vmul.f32 %v51_v4, %v39_v0  ;;  %v61_v8 = vstv %s341_s29  ;;  %v56_v9 = vmul.f32 %v55_v7, %v42_v1  ;;  %v67_v11 = vstv %s343_s0  ;;  %s368_s12 = sld [smem:[#allocation6 + $0xe]]  ;;  %s381_s13 = sld [smem:[#allocation6 + $0xf]] }
  0x2a   :  { %v62_v10 = vmul.f32 %v61_v8, %v45_v2  ;;  %v68_v12 = vmul.f32 %v67_v11, %v48_v3  ;;  %v89_v13 = vstv %s347_s3  ;;  %v53_v15 = vmul.f32 %v51_v4, %v40_v5  ;;  %s383_s14 = sld [smem:[#allocation6 + $0x10]]  ;;  %s385_s15 = sld [smem:[#allocation6 + $0x11]] }
  0x2b   :  { %v58_v16 = vadd.f32 %v56_v9, %v52_v6  ;;  %v90_v17 = vmul.f32 %v89_v13, %v39_v0  ;;  %v93_v18 = vstv %s349_s4  ;;  %v99_v19 = vstv %s351_s5  ;;  %s217_s16 = sld [smem:[#allocation6 + $0x12]]  ;;  %s305_s17 = smov [#allocation7]  }
  0x2c   :  { %v73_v20 = vstv %s345_s30  ;;  %v94_v21 = vmul.f32 %v93_v18, %v42_v1  ;;  %v100_v22 = vmul.f32 %v99_v19, %v45_v2  ;;  %v105_v23 = vstv %s353_s6  ;;  %s187_s18 = sshll.u32 %s305_s17, 4  ;;  %s188_s18 = int_to_ptr.vmem [resolvable:$true] %s187_s18 }
  0x2d   :  { %v64_v24 = vadd.f32 %v62_v10, %v58_v16  ;;  %v106_v25 = vmul.f32 %v105_v23, %v48_v3  ;;  %v129_v26 = vstv %s357_s8  ;;  %v57_v27 = vmul.f32 %v55_v7, %v43_v14  ;;  %s273_s19 = scalar_lea.vmem %s188_s18, 256  ;;  %p278_p0 = scmp.lt.s32.totalorder %s188_s18, %s188_s18 }
  0x2e   :  { %v96_v28 = vadd.f32 %v94_v21, %v90_v17  ;;  %v130_v29 = vmul.f32 %v129_v26, %v39_v0  ;;  %v133_v30 = vstv %s361_s9  ;;  %v139_v31 = vstv %s363_s10  ;;  %p274_p13 = scmp.ne.s32.totalorder %s188_s18, %s273_s19  ;;  %p279_p1 = scmp.lt.s32.totalorder %s273_s19, %s273_s19 }
  0x2f   :  { %v70_v32 = vadd.f32 %v68_v12, %v64_v24  ;;  %v134_v33 = vmul.f32 %v133_v30, %v42_v1  ;;  %v140_v34 = vmul.f32 %v139_v31, %v45_v2  ;;  %v145_v35 = vstv %s366_s11 }
  0x30   :  { %v102_v38 = vadd.f32 %v100_v22, %v96_v28  ;;  %v111_v39 = vstv %s355_s7  ;;  %v146_v40 = vmul.f32 %v145_v35, %v48_v3  ;;  %v151_v43 = vstv %s368_s12  ;;  %p280_p2 = por %p279_p1, %p278_p0 }
  0x31   :  { %v74_v41 = vadd.f32 %v73_v20, %v70_v32  ;;  %v136_v42 = vadd.f32 %v134_v33, %v130_v29  ;;  %v59_v44 = vadd.f32 %v57_v27, %v53_v15  ;;  %v63_v46 = vmul.f32 %v61_v8, %v46_v36 }
  0x32   :  { %v108_v45 = vadd.f32 %v106_v25, %v102_v38  ;;  %v69_v47 = vmul.f32 %v67_v11, %v49_v37  ;;  %v91_v48 = vmul.f32 %v89_v13, %v40_v5  ;;  %v95_v51 = vmul.f32 %v93_v18, %v43_v14  ;;  %p281_p3 = pnand %p280_p2, %p274_p13 }
  0x33   :  { %v76_v49 = vmul.f32 0.5, %v74_v41  ;;  %v142_v50 = vadd.f32 %v140_v34, %v136_v42  ;;  %v101_v52 = vmul.f32 %v99_v19, %v46_v36  ;;  %v65_v54 = vadd.f32 %v63_v46, %v59_v44 }
  0x34   :  { %v112_v53 = vadd.f32 %v111_v39, %v108_v45  ;;  %v107_v55 = vmul.f32 %v105_v23, %v49_v37  ;;  %v131_v56 = vmul.f32 %v129_v26, %v40_v5  ;;  %v97_v58 = vadd.f32 %v95_v51, %v91_v48 }
  0x35   :  { %223 = vtanh.f32 %v76_v49  ;;  %v148_v57 = vadd.f32 %v146_v40, %v142_v50  ;;  %v135_v59 = vmul.f32 %v133_v30, %v43_v14  ;;  %v71_v61 = vadd.f32 %v69_v47, %v65_v54 }
  0x36   :  { %v114_v60 = vmul.f32 0.5, %v112_v53  ;;  %v141_v62 = vmul.f32 %v139_v31, %v46_v36  ;;  %v103_v0 = vadd.f32 %v101_v52, %v97_v58  ;;  %v147_v2 = vmul.f32 %v145_v35, %v49_v37 }
  0x37   :  { %v152_v63 = vadd.f32 %v151_v43, %v148_v57  ;;  %v137_v1 = vadd.f32 %v135_v59, %v131_v56  ;;  %v75_v3 = vadd.f32 %v73_v20, %v71_v61  ;;  %v85_v17 = vstv %s381_s13 }
  0x38   :  { %225 = vtanh.f32 %v114_v60  ;;  %v109_v6 = vadd.f32 %v107_v55, %v103_v0  ;;  %v123_v19 = vstv %s383_s14  ;;  %v163_v26 = vstv %s385_s15 }
  0x39   :  { %v154_v4 = vmul.f32 0.5, %v152_v63  ;;  %v143_v7 = vadd.f32 %v141_v62, %v137_v1  ;;  %v77_v8 = vmul.f32 0.5, %v75_v3  ;;  %v169_v35 = vstv %s217_s16 }
  0x3a   :  { %v113_v5 = vadd.f32 %v111_v39, %v109_v6 }
  0x3b   :  { %227 = vtanh.f32 %v154_v4  ;;  %v149_v9 = vadd.f32 %v147_v2, %v143_v7 }
  0x3c   :  { %229 = vtanh.f32 %v77_v8  ;;  %v115_v10 = vmul.f32 0.5, %v113_v5 }
  0x3d   :  { %v153_v11 = vadd.f32 %v151_v43, %v149_v9 }
  0x3e   :  { %231 = vtanh.f32 %v115_v10 }
  0x3f   :  { %v224_v12 = vpop.eup %223  ;;  %v155_v13 = vmul.f32 0.5, %v153_v11 }
  0x40   :  { %v80_v14 = vmul.f32 0.5, %v224_v12 }
  0x41   :  { %233 = vtanh.f32 %v155_v13 }
  0x42   :  { %v226_v15 = vpop.eup %225  ;;  %v82_v16 = vadd.f32 0.5, %v80_v14 }
  0x43   :  { %v118_v18 = vmul.f32 0.5, %v226_v15 }
  0x44   :  { %v86_v21 = vmul.f32 %v85_v17, %v82_v16 }
  0x45   :  { %v228_v20 = vpop.eup %227  ;;  %v120_v22 = vadd.f32 0.5, %v118_v18 }
  0x46   :  { %v230_v23 = vpop.eup %229  ;;  %v158_v24 = vmul.f32 0.5, %v228_v20 }
  0x47   :  { %v124_v25 = vmul.f32 %v123_v19, %v120_v22  ;;  %v81_v27 = vmul.f32 0.5, %v230_v23 }
  0x48   :  { %v160_v28 = vadd.f32 0.5, %v158_v24  ;;  %v232_v29 = vpop.eup %231 }
  0x49   :  { %v126_v30 = vadd.f32 %v124_v25, %v86_v21  ;;  %v83_v31 = vadd.f32 0.5, %v81_v27  ;;  %v119_v33 = vmul.f32 0.5, %v232_v29 }
  0x4a   :  { %v164_v32 = vmul.f32 %v163_v26, %v160_v28 }
  0x4b   :  { %v234_v34 = vpop.eup %233  ;;  %v87_v37 = vmul.f32 %v85_v17, %v83_v31  ;;  %v121_v38 = vadd.f32 0.5, %v119_v33 }
  0x4c   :  { %v166_v36 = vadd.f32 %v164_v32, %v126_v30  ;;  %v159_v39 = vmul.f32 0.5, %v234_v34 }
  0x4d   :  { %v125_v41 = vmul.f32 %v123_v19, %v121_v38 }
  0x4e   :  { %v170_v40 = vadd.f32 %v169_v35, %v166_v36  ;;  %v161_v42 = vadd.f32 0.5, %v159_v39 }
  0x4f   :  { %v127_v44 = vadd.f32 %v125_v41, %v87_v37 }
  0x50   :  { %v172_v43 = vmul.f32 0.5, %v170_v40  ;;  %v165_v45 = vmul.f32 %v163_v26, %v161_v42 }
  0x52   :  { %235 = vtanh.f32 %v172_v43  ;;  %v167_v46 = vadd.f32 %v165_v45, %v127_v44 }
  0x54   :  { %v171_v47 = vadd.f32 %v169_v35, %v167_v46 }
  0x56   :  { %v173_v48 = vmul.f32 0.5, %v171_v47 }
  0x58   :  { %237 = vtanh.f32 %v173_v48 }
  0x5c   :  { %v236_v49 = vpop.eup %235 }
  0x5d   :  { %v176_v50 = vmul.f32 0.5, %v236_v49 }
  0x5f   :  { %v178_v51 = vadd.f32 0.5, %v176_v50 }
  0x61   :  { %180 = vst [vmem:[#allocation7] sm:$0xff] %v178_v51 }
  0x62   :  { %v238_v52 = vpop.eup %237 }
  0x63   :  { %v177_v53 = vmul.f32 0.5, %v238_v52 }
  0x65   :  { %v179_v54 = vadd.f32 0.5, %v177_v53 }
  0x67   :  { %181 = vst [vmem:[#allocation7 + $0x8] sm:$0xff] %v179_v54 }
  0x68   :  { %284 = shalt.err (!%p281_p3)
}
  0x69   :  { %s285_s23 = scalar_lea.hbm %s407_s2, 256 }
  0x6a   :  { %p286_p4 = scmp.ne.s32.totalorder %s407_s2, %s285_s23  ;;  %p289_p5 = scmp.lt.u32.totalorder %s285_s23, %s407_s2 }
  0x6c   :  { %p291_p6 = pnand %p289_p5, %p286_p4 }
  0x6e   :  { %294 = shalt.err (!%p291_p6)
}
  0x6f   :  { %193 = dma.vmem_to_hbm [thread:$0]  %s188_s18, 256, %s407_s2, [#allocation4], %s302_s1, %s302_s1, %s303_s22  }
  0x70   :  { %299 = dma.done.wait [#allocation4], 256  }
  0x71   :  { %300 = vsyncadd [#allocation4], 4294967040 }
  0x72   :  { %197 = vsyncpa [#allocation3], 1 }
  0x73   :  { %198 = vsyncpa [#allocation4], 1 }
  0x74   :  { %199 = vsyncpa [#allocation5], 1 }

</bundles_post_ra>
